<compile_context>
chip_gen: v7x
topology: tpu7x:2x2x1
jax: 0.10.0
libtpu: 0.0.40
codegen_flags: <defaults>
</compile_context>

<pallas_src>
import math
from functools import partial

import jax
import jax.numpy as jnp
from jax.experimental import pallas as pl
from jax.experimental.pallas import tpu as pltpu

LN_EPS = 1e-5


def _layernorm(z, gamma, beta):
    mu = jnp.mean(z, axis=-1, keepdims=True)
    var = jnp.mean((z - mu) ** 2, axis=-1, keepdims=True)
    return (z - mu) * jax.lax.rsqrt(var + LN_EPS) * gamma + beta


def hex_block_kernel(nhead, compute_dtype,
                     x_ref,
                     wqkv_ref, bqkv_ref, wo_ref, bo_ref, gw_ref, gb_ref,
                     w1_ref, b1_ref, w2_ref, b2_ref,
                     o_ref):
    x = x_ref[0]                                   # (S, D), f32
    S, D = x.shape
    H = nhead
    hd = D // H
    cdt = compute_dtype
    f32_path = jnp.dtype(cdt) == jnp.dtype(jnp.float32)

    x_c = x.astype(cdt)

    # ---- Fused lane-dense QKV projection: (S, D) x (D, 3D), N = 3D ----
    # 1/sqrt(hd) is already folded into the Q columns / bias host-side.
    qkv = jnp.dot(x_c, wqkv_ref[...],
                  preferred_element_type=jnp.float32) + bqkv_ref[...]   # (S, 3D) f32

    # Split heads into a leading batch dim: (H, S, hd).  Static lane slices +
    # stack (cheap relayout relative to the matmuls; no per-head matmuls).
    def split_heads(base):
        return jnp.stack(
            [qkv[:, base + h * hd: base + (h + 1) * hd] for h in range(H)],
            axis=0)

    qh = split_heads(0).astype(cdt)
    kh = split_heads(D).astype(cdt)
    vh = split_heads(2 * D).astype(cdt)

    # ---- Scores (H, S, S); softmax in f32 ----
    s = jnp.einsum('hqe,hke->hqk', qh, kh,
                   preferred_element_type=jnp.float32)
    s = s - jnp.max(s, axis=-1, keepdims=True)
    p = jnp.exp(s)
    denom = jnp.sum(p, axis=-1, keepdims=True)
    if f32_path:
        p = p / denom                               # exact on verification path
    else:
        p = p * pl.reciprocal(denom, approx=True)   # EUP slot on fast path

    # ---- Context (H, S, hd) ----
    ctx = jnp.einsum('hqk,hke->hqe', p.astype(cdt), vh,
                     preferred_element_type=jnp.float32)

    # ---- Head concat back onto lanes, then ONE full-K out-projection ----
    ctx_sd = jnp.concatenate([ctx[h] for h in range(H)], axis=-1)        # (S, D)
    attn = jnp.dot(ctx_sd.astype(cdt), wo_ref[...],
                   preferred_element_type=jnp.float32) + bo_ref[...]     # (S, D) f32

    gamma = gw_ref[...]                              # (1, D)
    beta = gb_ref[...]                               # (1, D)

    # ---- residual + shared LayerNorm (f32) ----
    y = _layernorm(x + attn, gamma, beta)

    # ---- feed-forward: Linear -> SiLU -> (Dropout) -> Linear -> (Dropout) ----
    h1 = jnp.dot(y.astype(cdt), w1_ref[...],
                 preferred_element_type=jnp.float32) + b1_ref[...]
    h1 = h1 * jax.nn.sigmoid(h1)                     # SiLU in f32 (EUP)
    h2 = jnp.dot(h1.astype(cdt), w2_ref[...],
                 preferred_element_type=jnp.float32) + b2_ref[...]

    # ---- residual + shared LayerNorm (same weights) ----
    o_ref[0] = _layernorm(y + h2, gamma, beta)


def _prep_params(params, nhead, compute_dtype):
    """Host-side, one-time weight re-layout (pre-transpose, fused QKV,
    scale folding, bf16 cast).  All free relative to the kernel."""
    (wqkv, bqkv, wo, bo, gw, gb, w1, b1, w2, b2) = params
    D = wo.shape[0]
    if D % nhead:
        raise ValueError(f"dim={D} must be divisible by nhead={nhead}")
    hd = D // nhead
    scale = 1.0 / math.sqrt(hd)
    wdt = compute_dtype
    f32 = jnp.float32

    # Fold the 1/sqrt(hd) attention scale into the Q rows of the in-projection.
    row_scale = jnp.concatenate([jnp.full((D,), scale, f32),
                                 jnp.ones((2 * D,), f32)])
    wqkv_t = (wqkv * row_scale[:, None]).T.astype(wdt)          # (D, 3D)
    bqkv_p = (bqkv.reshape(1, 3 * D) * row_scale[None, :]).astype(f32)

    wo_t = wo.T.astype(wdt)                                     # (D, D)
    w1_t = w1.T.astype(wdt)
    w2_t = w2.T.astype(wdt)
    return (wqkv_t, bqkv_p, wo_t,
            bo.astype(f32), gw.astype(f32), gb.astype(f32),
            w1_t, b1.astype(f32), w2_t, b2.astype(f32))


def _pick_vmem_limit():
    """~75% of physical VMEM: ~96 MiB on v5e/v6e, ~48 MiB on v7x."""
    try:
        cap = pltpu.get_tpu_info().vmem_capacity_bytes
        return max(32 * 1024 * 1024, min(int(cap * 3 // 4), 100 * 1024 * 1024))
    except Exception:
        return 48 * 1024 * 1024      # safe on every generation


def _const_spec(shape):
    """BlockSpec for a grid-invariant weight: single-buffered if supported."""
    idx = lambda b: (0,) * len(shape)
    try:
        return pl.BlockSpec(shape, idx, pipeline_mode=pl.Buffered(1))
    except Exception:
        return pl.BlockSpec(shape, idx)


def hex_transformer_block(x, params, nhead, compute_dtype=jnp.bfloat16,
                          vmem_limit_bytes=None):
    B, S, D = x.shape
    prepped = _prep_params(params, nhead, compute_dtype)

    in_specs = [pl.BlockSpec((1, S, D), lambda b: (b, 0, 0))]
    in_specs += [_const_spec(a.shape) for a in prepped]

    if vmem_limit_bytes is None:
        vmem_limit_bytes = _pick_vmem_limit()

    # Advisory cost for XLA's scheduler.
    flops = 2 * B * S * D * (6 * D + 2 * S)
    transcendentals = B * S * (nhead * S + D)
    wbytes = sum(int(a.size) * a.dtype.itemsize for a in prepped)
    bytes_accessed = 2 * B * S * D * 4 + wbytes
    cost = pl.CostEstimate(flops=int(flops),
                           transcendentals=int(transcendentals),
                           bytes_accessed=int(bytes_accessed))

    return pl.pallas_call(
        partial(hex_block_kernel, nhead, compute_dtype),
        out_shape=jax.ShapeDtypeStruct((B, S, D), jnp.float32),
        grid_spec=pltpu.PrefetchScalarGridSpec(
            num_scalar_prefetch=0,
            grid=(B,),
            in_specs=in_specs,
            out_specs=pl.BlockSpec((1, S, D), lambda b: (b, 0, 0)),
        ),
        compiler_params=pltpu.CompilerParams(
            dimension_semantics=("parallel",),
            vmem_limit_bytes=int(vmem_limit_bytes)),
        cost_estimate=cost,
    )(x.astype(jnp.float32), *prepped)


def init_params(key, dim):
    """Deterministic synthetic parameters matching the PyTorch module shapes."""
    ks = jax.random.split(key, 8)
    s = 0.1
    wqkv = jax.random.normal(ks[0], (3 * dim, dim), jnp.float32) * s   # in_proj_weight
    bqkv = jax.random.normal(ks[1], (1, 3 * dim), jnp.float32) * s     # in_proj_bias
    wo = jax.random.normal(ks[2], (dim, dim), jnp.float32) * s         # out_proj.weight
    bo = jax.random.normal(ks[3], (1, dim), jnp.float32) * s           # out_proj.bias
    gw = jnp.ones((1, dim), jnp.float32)                               # norm.weight
    gb = jnp.zeros((1, dim), jnp.float32)                              # norm.bias
    w1 = jax.random.normal(ks[4], (dim, dim), jnp.float32) * s         # feed_forward[0].weight
    b1 = jax.random.normal(ks[5], (1, dim), jnp.float32) * s           # feed_forward[0].bias
    w2 = jax.random.normal(ks[6], (dim, dim), jnp.float32) * s         # feed_forward[3].weight
    b2 = jax.random.normal(ks[7], (1, dim), jnp.float32) * s           # feed_forward[3].bias
    return (wqkv, bqkv, wo, bo, gw, gb, w1, b1, w2, b2)


def reference_block(x, params, nhead):
    """Plain-JAX f32 reference mirroring the PyTorch forward (eval mode)."""
    (wqkv, bqkv, wo, bo, gw, gb, w1, b1, w2, b2) = params
    B, S, D = x.shape
    hd = D // nhead
    qkv = jnp.einsum("bsd,ed->bse", x, wqkv) + bqkv[0]
    q, k, v = qkv[..., :D], qkv[..., D:2 * D], qkv[..., 2 * D:]
    q = q.reshape(B, S, nhead, hd).transpose(0, 2, 1, 3)
    k = k.reshape(B, S, nhead, hd).transpose(0, 2, 1, 3)
    v = v.reshape(B, S, nhead, hd).transpose(0, 2, 1, 3)
    s = jnp.einsum("bhqd,bhkd->bhqk", q, k) / math.sqrt(hd)
    p = jax.nn.softmax(s, axis=-1)
    a = jnp.einsum("bhqk,bhkd->bhqd", p, v).transpose(0, 2, 1, 3).reshape(B, S, D)
    a = jnp.einsum("bsd,ed->bse", a, wo) + bo[0]

    def ln(z):
        mu = jnp.mean(z, axis=-1, keepdims=True)
        var = jnp.mean((z - mu) ** 2, axis=-1, keepdims=True)
        return (z - mu) * jax.lax.rsqrt(var + LN_EPS) * gw[0] + gb[0]

    y = ln(x + a)
    h1 = jnp.einsum("bsd,ed->bse", y, w1) + b1[0]
    h1 = h1 * jax.nn.sigmoid(h1)
    h2 = jnp.einsum("bsd,ed->bse", h1, w2) + b2[0]
    return ln(y + h2)


if __name__ == "__main__":
    B, S, D, NHEAD = 4, 8, 32, 4
    key = jax.random.PRNGKey(0)
    kx, kp = jax.random.split(key)
    x = jax.random.normal(kx, (B, S, D), jnp.float32)
    params = init_params(kp, D)

    ref = reference_block(x, params, NHEAD)

    # f32 compute path: tight structural-correctness check.
    out_f32 = jax.block_until_ready(hex_transformer_block(x, params, NHEAD, jnp.float32))
    assert out_f32.shape == (B, S, D)
    err32 = float(jnp.max(jnp.abs(out_f32 - ref)))
    assert err32 < 1e-2, f"f32 path mismatch vs reference: {err32}"

    # default fast path: bf16 MXU operands, f32 accumulation / norms / softmax.
    out = jax.block_until_ready(hex_transformer_block(x, params, NHEAD))
    assert out.shape == (B, S, D)
    err16 = float(jnp.max(jnp.abs(out - ref)))
    assert err16 < 1e-1, f"bf16 path mismatch vs f32 reference: {err16}"

    print("KERNEL_OK")
</pallas_src>

<mosaic_0001>
module attributes {stable_mosaic.version = 11 : i64} {
  func.func @hex_block_kernel(%arg0: i32, %arg1: memref<1x8x32xf32, #tpu.memory_space<vmem>>, %arg2: memref<32x96xf32, #tpu.memory_space<vmem>>, %arg3: memref<1x96xf32, #tpu.memory_space<vmem>>, %arg4: memref<32x32xf32, #tpu.memory_space<vmem>>, %arg5: memref<1x32xf32, #tpu.memory_space<vmem>>, %arg6: memref<1x32xf32, #tpu.memory_space<vmem>>, %arg7: memref<1x32xf32, #tpu.memory_space<vmem>>, %arg8: memref<32x32xf32, #tpu.memory_space<vmem>>, %arg9: memref<1x32xf32, #tpu.memory_space<vmem>>, %arg10: memref<32x32xf32, #tpu.memory_space<vmem>>, %arg11: memref<1x32xf32, #tpu.memory_space<vmem>>, %arg12: memref<1x8x32xf32, #tpu.memory_space<vmem>>) attributes {dimension_semantics = [#tpu.dimension_semantics<parallel>], iteration_bounds = array<i64: 4>, scalar_prefetch = 0 : i64, scratch_operands = 0 : i64, tpu.core_type = #tpu.core_type<tc>, window_params = [{transform_indices = @transform_0, window_bounds = array<i64: 1, 8, 32>}, {pipeline_mode = #tpu.pipeline_mode<synchronous>, transform_indices = @transform_1, window_bounds = array<i64: 32, 96>}, {pipeline_mode = #tpu.pipeline_mode<synchronous>, transform_indices = @transform_2, window_bounds = array<i64: 1, 96>}, {pipeline_mode = #tpu.pipeline_mode<synchronous>, transform_indices = @transform_3, window_bounds = array<i64: 32, 32>}, {pipeline_mode = #tpu.pipeline_mode<synchronous>, transform_indices = @transform_4, window_bounds = array<i64: 1, 32>}, {pipeline_mode = #tpu.pipeline_mode<synchronous>, transform_indices = @transform_5, window_bounds = array<i64: 1, 32>}, {pipeline_mode = #tpu.pipeline_mode<synchronous>, transform_indices = @transform_6, window_bounds = array<i64: 1, 32>}, {pipeline_mode = #tpu.pipeline_mode<synchronous>, transform_indices = @transform_7, window_bounds = array<i64: 32, 32>}, {pipeline_mode = #tpu.pipeline_mode<synchronous>, transform_indices = @transform_8, window_bounds = array<i64: 1, 32>}, {pipeline_mode = #tpu.pipeline_mode<synchronous>, transform_indices = @transform_9, window_bounds = array<i64: 32, 32>}, {pipeline_mode = #tpu.pipeline_mode<synchronous>, transform_indices = @transform_10, window_bounds = array<i64: 1, 32>}, {transform_indices = @transform_11, window_bounds = array<i64: 1, 8, 32>}]} {
    %c0 = arith.constant 0 : index
    %c0_0 = arith.constant 0 : index
    %c0_1 = arith.constant 0 : index
    %0 = vector.load %arg1[%c0, %c0_0, %c0_1] : memref<1x8x32xf32, #tpu.memory_space<vmem>>, vector<1x8x32xf32>
    %1 = vector.shape_cast %0 : vector<1x8x32xf32> to vector<8x32xf32>
    %c0_2 = arith.constant 0 : index
    %c0_3 = arith.constant 0 : index
    %2 = vector.load %arg2[%c0_2, %c0_3] : memref<32x96xf32, #tpu.memory_space<vmem>>, vector<32x96xf32>
    %cst = arith.constant dense<0.000000e+00> : vector<8x96xf32>
    %3 = tpu.matmul %1, %2, %cst {dimension_numbers = #tpu.dot_dimension_numbers<[1], [0], [0], [1], [0, 0, 1, 1], [], []>} : vector<8x32xf32>, vector<32x96xf32>, vector<8x96xf32> -> vector<8x96xf32>
    %c0_4 = arith.constant 0 : index
    %c0_5 = arith.constant 0 : index
    %4 = vector.load %arg3[%c0_4, %c0_5] : memref<1x96xf32, #tpu.memory_space<vmem>>, vector<1x96xf32>
    %5 = vector.broadcast %4 : vector<1x96xf32> to vector<8x96xf32>
    %6 = arith.addf %3, %5 : vector<8x96xf32>
    %7 = vector.extract_strided_slice %6 {offsets = [0, 0], sizes = [8, 8], strides = [1, 1]} : vector<8x96xf32> to vector<8x8xf32>
    %8 = vector.extract_strided_slice %6 {offsets = [0, 8], sizes = [8, 8], strides = [1, 1]} : vector<8x96xf32> to vector<8x8xf32>
    %9 = vector.extract_strided_slice %6 {offsets = [0, 16], sizes = [8, 8], strides = [1, 1]} : vector<8x96xf32> to vector<8x8xf32>
    %10 = vector.extract_strided_slice %6 {offsets = [0, 24], sizes = [8, 8], strides = [1, 1]} : vector<8x96xf32> to vector<8x8xf32>
    %11 = vector.shape_cast %7 : vector<8x8xf32> to vector<1x8x8xf32>
    %12 = vector.shape_cast %8 : vector<8x8xf32> to vector<1x8x8xf32>
    %13 = vector.shape_cast %9 : vector<8x8xf32> to vector<1x8x8xf32>
    %14 = vector.shape_cast %10 : vector<8x8xf32> to vector<1x8x8xf32>
    %15 = tpu.concatenate %11, %12, %13, %14 in 0 : vector<1x8x8xf32>, vector<1x8x8xf32>, vector<1x8x8xf32>, vector<1x8x8xf32> -> vector<4x8x8xf32>
    %16 = vector.extract_strided_slice %6 {offsets = [0, 32], sizes = [8, 8], strides = [1, 1]} : vector<8x96xf32> to vector<8x8xf32>
    %17 = vector.extract_strided_slice %6 {offsets = [0, 40], sizes = [8, 8], strides = [1, 1]} : vector<8x96xf32> to vector<8x8xf32>
    %18 = vector.extract_strided_slice %6 {offsets = [0, 48], sizes = [8, 8], strides = [1, 1]} : vector<8x96xf32> to vector<8x8xf32>
    %19 = vector.extract_strided_slice %6 {offsets = [0, 56], sizes = [8, 8], strides = [1, 1]} : vector<8x96xf32> to vector<8x8xf32>
    %20 = vector.shape_cast %16 : vector<8x8xf32> to vector<1x8x8xf32>
    %21 = vector.shape_cast %17 : vector<8x8xf32> to vector<1x8x8xf32>
    %22 = vector.shape_cast %18 : vector<8x8xf32> to vector<1x8x8xf32>
    %23 = vector.shape_cast %19 : vector<8x8xf32> to vector<1x8x8xf32>
    %24 = tpu.concatenate %20, %21, %22, %23 in 0 : vector<1x8x8xf32>, vector<1x8x8xf32>, vector<1x8x8xf32>, vector<1x8x8xf32> -> vector<4x8x8xf32>
    %25 = vector.extract_strided_slice %6 {offsets = [0, 64], sizes = [8, 8], strides = [1, 1]} : vector<8x96xf32> to vector<8x8xf32>
    %26 = vector.extract_strided_slice %6 {offsets = [0, 72], sizes = [8, 8], strides = [1, 1]} : vector<8x96xf32> to vector<8x8xf32>
    %27 = vector.extract_strided_slice %6 {offsets = [0, 80], sizes = [8, 8], strides = [1, 1]} : vector<8x96xf32> to vector<8x8xf32>
    %28 = vector.extract_strided_slice %6 {offsets = [0, 88], sizes = [8, 8], strides = [1, 1]} : vector<8x96xf32> to vector<8x8xf32>
    %29 = vector.shape_cast %25 : vector<8x8xf32> to vector<1x8x8xf32>
    %30 = vector.shape_cast %26 : vector<8x8xf32> to vector<1x8x8xf32>
    %31 = vector.shape_cast %27 : vector<8x8xf32> to vector<1x8x8xf32>
    %32 = vector.shape_cast %28 : vector<8x8xf32> to vector<1x8x8xf32>
    %33 = tpu.concatenate %29, %30, %31, %32 in 0 : vector<1x8x8xf32>, vector<1x8x8xf32>, vector<1x8x8xf32>, vector<1x8x8xf32> -> vector<4x8x8xf32>
    "tpu.trace_start"() <{level = 10 : i32, message = "hqe,hke->hqk"}> : () -> ()
    %cst_6 = arith.constant dense<0.000000e+00> : vector<4x8x8xf32>
    %34 = tpu.matmul %15, %24, %cst_6 {dimension_numbers = #tpu.dot_dimension_numbers<[2], [2], [1], [1], [0, 0, 0, 1, 1, 1], [0], [0]>} : vector<4x8x8xf32>, vector<4x8x8xf32>, vector<4x8x8xf32> -> vector<4x8x8xf32>
    "tpu.trace_stop"() : () -> ()
    %cst_7 = arith.constant dense<0xFF800000> : vector<4x8xf32>
    %35 = vector.multi_reduction <maximumf>, %34, %cst_7 [2] : vector<4x8x8xf32> to vector<4x8xf32>
    %36 = vector.shape_cast %35 : vector<4x8xf32> to vector<4x8x1xf32>
    %37 = vector.broadcast %36 : vector<4x8x1xf32> to vector<4x8x8xf32>
    %38 = arith.subf %34, %37 : vector<4x8x8xf32>
    %39 = math.exp %38 : vector<4x8x8xf32>
    %cst_8 = arith.constant dense<0.000000e+00> : vector<4x8xf32>
    %40 = vector.multi_reduction <add>, %39, %cst_8 [2] : vector<4x8x8xf32> to vector<4x8xf32>
    %41 = vector.shape_cast %40 : vector<4x8xf32> to vector<4x8x1xf32>
    %42 = vector.broadcast %41 : vector<4x8x1xf32> to vector<4x8x8xf32>
    %43 = arith.divf %39, %42 : vector<4x8x8xf32>
    "tpu.trace_start"() <{level = 10 : i32, message = "hqk,hke->hqe"}> : () -> ()
    %cst_9 = arith.constant dense<0.000000e+00> : vector<4x8x8xf32>
    %44 = tpu.matmul %43, %33, %cst_9 {dimension_numbers = #tpu.dot_dimension_numbers<[2], [1], [1], [2], [0, 0, 0, 1, 1, 2], [0], [0]>} : vector<4x8x8xf32>, vector<4x8x8xf32>, vector<4x8x8xf32> -> vector<4x8x8xf32>
    "tpu.trace_stop"() : () -> ()
    %45 = vector.extract_strided_slice %44 {offsets = [0, 0, 0], sizes = [1, 8, 8], strides = [1, 1, 1]} : vector<4x8x8xf32> to vector<1x8x8xf32>
    %46 = vector.shape_cast %45 : vector<1x8x8xf32> to vector<8x8xf32>
    %47 = vector.extract_strided_slice %44 {offsets = [1, 0, 0], sizes = [1, 8, 8], strides = [1, 1, 1]} : vector<4x8x8xf32> to vector<1x8x8xf32>
    %48 = vector.shape_cast %47 : vector<1x8x8xf32> to vector<8x8xf32>
    %49 = vector.extract_strided_slice %44 {offsets = [2, 0, 0], sizes = [1, 8, 8], strides = [1, 1, 1]} : vector<4x8x8xf32> to vector<1x8x8xf32>
    %50 = vector.shape_cast %49 : vector<1x8x8xf32> to vector<8x8xf32>
    %51 = vector.extract_strided_slice %44 {offsets = [3, 0, 0], sizes = [1, 8, 8], strides = [1, 1, 1]} : vector<4x8x8xf32> to vector<1x8x8xf32>
    %52 = vector.shape_cast %51 : vector<1x8x8xf32> to vector<8x8xf32>
    %53 = tpu.concatenate %46, %48, %50, %52 in 1 : vector<8x8xf32>, vector<8x8xf32>, vector<8x8xf32>, vector<8x8xf32> -> vector<8x32xf32>
    %c0_10 = arith.constant 0 : index
    %c0_11 = arith.constant 0 : index
    %54 = vector.load %arg4[%c0_10, %c0_11] : memref<32x32xf32, #tpu.memory_space<vmem>>, vector<32x32xf32>
    %cst_12 = arith.constant dense<0.000000e+00> : vector<8x32xf32>
    %55 = tpu.matmul %53, %54, %cst_12 {dimension_numbers = #tpu.dot_dimension_numbers<[1], [0], [0], [1], [0, 0, 1, 1], [], []>} : vector<8x32xf32>, vector<32x32xf32>, vector<8x32xf32> -> vector<8x32xf32>
    %c0_13 = arith.constant 0 : index
    %c0_14 = arith.constant 0 : index
    %56 = vector.load %arg5[%c0_13, %c0_14] : memref<1x32xf32, #tpu.memory_space<vmem>>, vector<1x32xf32>
    %57 = vector.broadcast %56 : vector<1x32xf32> to vector<8x32xf32>
    %58 = arith.addf %55, %57 : vector<8x32xf32>
    %c0_15 = arith.constant 0 : index
    %c0_16 = arith.constant 0 : index
    %59 = vector.load %arg6[%c0_15, %c0_16] : memref<1x32xf32, #tpu.memory_space<vmem>>, vector<1x32xf32>
    %c0_17 = arith.constant 0 : index
    %c0_18 = arith.constant 0 : index
    %60 = vector.load %arg7[%c0_17, %c0_18] : memref<1x32xf32, #tpu.memory_space<vmem>>, vector<1x32xf32>
    %61 = arith.addf %1, %58 : vector<8x32xf32>
    %cst_19 = arith.constant dense<0.000000e+00> : vector<8xf32>
    %62 = vector.multi_reduction <add>, %61, %cst_19 [1] : vector<8x32xf32> to vector<8xf32>
    %63 = vector.shape_cast %62 : vector<8xf32> to vector<8x1xf32>
    %cst_20 = arith.constant 3.200000e+01 : f32
    %64 = vector.broadcast %cst_20 : f32 to vector<8x1xf32>
    %65 = arith.divf %63, %64 : vector<8x1xf32>
    %66 = vector.broadcast %65 : vector<8x1xf32> to vector<8x32xf32>
    %67 = arith.subf %61, %66 : vector<8x32xf32>
    %68 = arith.mulf %67, %67 : vector<8x32xf32>
    %cst_21 = arith.constant dense<0.000000e+00> : vector<8xf32>
    %69 = vector.multi_reduction <add>, %68, %cst_21 [1] : vector<8x32xf32> to vector<8xf32>
    %70 = vector.shape_cast %69 : vector<8xf32> to vector<8x1xf32>
    %cst_22 = arith.constant 3.200000e+01 : f32
    %71 = vector.broadcast %cst_22 : f32 to vector<8x1xf32>
    %72 = arith.divf %70, %71 : vector<8x1xf32>
    %73 = vector.broadcast %65 : vector<8x1xf32> to vector<8x32xf32>
    %74 = arith.subf %61, %73 : vector<8x32xf32>
    %cst_23 = arith.constant 9.99999974E-6 : f32
    %75 = vector.broadcast %cst_23 : f32 to vector<8x1xf32>
    %76 = arith.addf %72, %75 : vector<8x1xf32>
    %77 = math.rsqrt %76 : vector<8x1xf32>
    %78 = vector.broadcast %77 : vector<8x1xf32> to vector<8x32xf32>
    %79 = arith.mulf %74, %78 : vector<8x32xf32>
    %80 = vector.broadcast %59 : vector<1x32xf32> to vector<8x32xf32>
    %81 = arith.mulf %79, %80 : vector<8x32xf32>
    %82 = vector.broadcast %60 : vector<1x32xf32> to vector<8x32xf32>
    %83 = arith.addf %81, %82 : vector<8x32xf32>
    %c0_24 = arith.constant 0 : index
    %c0_25 = arith.constant 0 : index
    %84 = vector.load %arg8[%c0_24, %c0_25] : memref<32x32xf32, #tpu.memory_space<vmem>>, vector<32x32xf32>
    %cst_26 = arith.constant dense<0.000000e+00> : vector<8x32xf32>
    %85 = tpu.matmul %83, %84, %cst_26 {dimension_numbers = #tpu.dot_dimension_numbers<[1], [0], [0], [1], [0, 0, 1, 1], [], []>} : vector<8x32xf32>, vector<32x32xf32>, vector<8x32xf32> -> vector<8x32xf32>
    %c0_27 = arith.constant 0 : index
    %c0_28 = arith.constant 0 : index
    %86 = vector.load %arg9[%c0_27, %c0_28] : memref<1x32xf32, #tpu.memory_space<vmem>>, vector<1x32xf32>
    %87 = vector.broadcast %86 : vector<1x32xf32> to vector<8x32xf32>
    %88 = arith.addf %85, %87 : vector<8x32xf32>
    %89 = arith.negf %88 : vector<8x32xf32>
    %90 = math.exp %89 : vector<8x32xf32>
    %cst_29 = arith.constant 1.000000e+00 : f32
    %91 = vector.broadcast %cst_29 : f32 to vector<8x32xf32>
    %92 = arith.addf %91, %90 : vector<8x32xf32>
    %93 = arith.divf %91, %92 : vector<8x32xf32>
    %94 = arith.mulf %88, %93 : vector<8x32xf32>
    %c0_30 = arith.constant 0 : index
    %c0_31 = arith.constant 0 : index
    %95 = vector.load %arg10[%c0_30, %c0_31] : memref<32x32xf32, #tpu.memory_space<vmem>>, vector<32x32xf32>
    %cst_32 = arith.constant dense<0.000000e+00> : vector<8x32xf32>
    %96 = tpu.matmul %94, %95, %cst_32 {dimension_numbers = #tpu.dot_dimension_numbers<[1], [0], [0], [1], [0, 0, 1, 1], [], []>} : vector<8x32xf32>, vector<32x32xf32>, vector<8x32xf32> -> vector<8x32xf32>
    %c0_33 = arith.constant 0 : index
    %c0_34 = arith.constant 0 : index
    %97 = vector.load %arg11[%c0_33, %c0_34] : memref<1x32xf32, #tpu.memory_space<vmem>>, vector<1x32xf32>
    %98 = vector.broadcast %97 : vector<1x32xf32> to vector<8x32xf32>
    %99 = arith.addf %96, %98 : vector<8x32xf32>
    %100 = arith.addf %83, %99 : vector<8x32xf32>
    %cst_35 = arith.constant dense<0.000000e+00> : vector<8xf32>
    %101 = vector.multi_reduction <add>, %100, %cst_35 [1] : vector<8x32xf32> to vector<8xf32>
    %102 = vector.shape_cast %101 : vector<8xf32> to vector<8x1xf32>
    %cst_36 = arith.constant 3.200000e+01 : f32
    %103 = vector.broadcast %cst_36 : f32 to vector<8x1xf32>
    %104 = arith.divf %102, %103 : vector<8x1xf32>
    %105 = vector.broadcast %104 : vector<8x1xf32> to vector<8x32xf32>
    %106 = arith.subf %100, %105 : vector<8x32xf32>
    %107 = arith.mulf %106, %106 : vector<8x32xf32>
    %cst_37 = arith.constant dense<0.000000e+00> : vector<8xf32>
    %108 = vector.multi_reduction <add>, %107, %cst_37 [1] : vector<8x32xf32> to vector<8xf32>
    %109 = vector.shape_cast %108 : vector<8xf32> to vector<8x1xf32>
    %cst_38 = arith.constant 3.200000e+01 : f32
    %110 = vector.broadcast %cst_38 : f32 to vector<8x1xf32>
    %111 = arith.divf %109, %110 : vector<8x1xf32>
    %112 = vector.broadcast %104 : vector<8x1xf32> to vector<8x32xf32>
    %113 = arith.subf %100, %112 : vector<8x32xf32>
    %cst_39 = arith.constant 9.99999974E-6 : f32
    %114 = vector.broadcast %cst_39 : f32 to vector<8x1xf32>
    %115 = arith.addf %111, %114 : vector<8x1xf32>
    %116 = math.rsqrt %115 : vector<8x1xf32>
    %117 = vector.broadcast %116 : vector<8x1xf32> to vector<8x32xf32>
    %118 = arith.mulf %113, %117 : vector<8x32xf32>
    %119 = vector.broadcast %59 : vector<1x32xf32> to vector<8x32xf32>
    %120 = arith.mulf %118, %119 : vector<8x32xf32>
    %121 = vector.broadcast %60 : vector<1x32xf32> to vector<8x32xf32>
    %122 = arith.addf %120, %121 : vector<8x32xf32>
    %c0_40 = arith.constant 0 : index
    %c0_41 = arith.constant 0 : index
    %c0_42 = arith.constant 0 : index
    %123 = vector.load %arg12[%c0_40, %c0_41, %c0_42] : memref<1x8x32xf32, #tpu.memory_space<vmem>>, vector<1x8x32xf32>
    %124 = vector.shape_cast %123 : vector<1x8x32xf32> to vector<8x32xf32>
    %125 = vector.shape_cast %122 : vector<8x32xf32> to vector<1x8x32xf32>
    tpu.vector_store %arg12[%c0_40, %c0_41, %c0_42], %125 {strides = array<i32>} : memref<1x8x32xf32, #tpu.memory_space<vmem>>, vector<1x8x32xf32>,
    return
  }
  func.func @transform_0(%arg0: i32) -> (i32, i32, i32) {
    %c0_i32 = arith.constant 0 : i32
    %c0_i32_0 = arith.constant 0 : i32
    %c0_i32_1 = arith.constant 0 : i32
    return %arg0, %c0_i32, %c0_i32_0 : i32, i32, i32
  }
  func.func @transform_1(%arg0: i32) -> (i32, i32) {
    %c0_i32 = arith.constant 0 : i32
    %c0_i32_0 = arith.constant 0 : i32
    %c0_i32_1 = arith.constant 0 : i32
    return %c0_i32, %c0_i32_0 : i32, i32
  }
  func.func @transform_2(%arg0: i32) -> (i32, i32) {
    %c0_i32 = arith.constant 0 : i32
    %c0_i32_0 = arith.constant 0 : i32
    %c0_i32_1 = arith.constant 0 : i32
    return %c0_i32, %c0_i32_0 : i32, i32
  }
  func.func @transform_3(%arg0: i32) -> (i32, i32) {
    %c0_i32 = arith.constant 0 : i32
    %c0_i32_0 = arith.constant 0 : i32
    %c0_i32_1 = arith.constant 0 : i32
    return %c0_i32, %c0_i32_0 : i32, i32
  }
  func.func @transform_4(%arg0: i32) -> (i32, i32) {
    %c0_i32 = arith.constant 0 : i32
    %c0_i32_0 = arith.constant 0 : i32
    %c0_i32_1 = arith.constant 0 : i32
    return %c0_i32, %c0_i32_0 : i32, i32
  }
  func.func @transform_5(%arg0: i32) -> (i32, i32) {
    %c0_i32 = arith.constant 0 : i32
    %c0_i32_0 = arith.constant 0 : i32
    %c0_i32_1 = arith.constant 0 : i32
    return %c0_i32, %c0_i32_0 : i32, i32
  }
  func.func @transform_6(%arg0: i32) -> (i32, i32) {
    %c0_i32 = arith.constant 0 : i32
    %c0_i32_0 = arith.constant 0 : i32
    %c0_i32_1 = arith.constant 0 : i32
    return %c0_i32, %c0_i32_0 : i32, i32
  }
  func.func @transform_7(%arg0: i32) -> (i32, i32) {
    %c0_i32 = arith.constant 0 : i32
    %c0_i32_0 = arith.constant 0 : i32
    %c0_i32_1 = arith.constant 0 : i32
    return %c0_i32, %c0_i32_0 : i32, i32
  }
  func.func @transform_8(%arg0: i32) -> (i32, i32) {
    %c0_i32 = arith.constant 0 : i32
    %c0_i32_0 = arith.constant 0 : i32
    %c0_i32_1 = arith.constant 0 : i32
    return %c0_i32, %c0_i32_0 : i32, i32
  }
  func.func @transform_9(%arg0: i32) -> (i32, i32) {
    %c0_i32 = arith.constant 0 : i32
    %c0_i32_0 = arith.constant 0 : i32
    %c0_i32_1 = arith.constant 0 : i32
    return %c0_i32, %c0_i32_0 : i32, i32
  }
  func.func @transform_10(%arg0: i32) -> (i32, i32) {
    %c0_i32 = arith.constant 0 : i32
    %c0_i32_0 = arith.constant 0 : i32
    %c0_i32_1 = arith.constant 0 : i32
    return %c0_i32, %c0_i32_0 : i32, i32
  }
  func.func @transform_11(%arg0: i32) -> (i32, i32, i32) {
    %c0_i32 = arith.constant 0 : i32
    %c0_i32_0 = arith.constant 0 : i32
    %c0_i32_1 = arith.constant 0 : i32
    return %arg0, %c0_i32, %c0_i32_0 : i32, i32, i32
  }
}

</mosaic_0001>

<bundles_post_ra>
// kernel: tpu_custom_call.1
= control target key start
LH: loop header
LB: loop body
LE: loop exit
PB: predicated region body
PF: predicated region fallthrough
CT: control target
= control target key end

     0   :  { %s2829_s0 = inlined_call_operand.hbm [shape: f32[4,8,32], index: 0, kind: input, shape index: {}]   ;;  %s2830_s1 = inlined_call_operand.hbm [shape: f32[32,96], index: 1, kind: input, shape index: {}]   ;;  %s2831_s2 = inlined_call_operand.vmem [shape: f32[1,96], index: 2, kind: input, shape index: {}]   ;;  %s2832_s3 = inlined_call_operand.hbm [shape: f32[32,32], index: 3, kind: input, shape index: {}]   ;;  %s2833_s4 = inlined_call_operand.vmem [shape: f32[1,32], index: 4, kind: input, shape index: {}]   ;;  %s2834_s5 = inlined_call_operand.hbm [shape: f32[1,32], index: 5, kind: input, shape index: {}]   ;;  %s2835_s6 = inlined_call_operand.hbm [shape: f32[1,32], index: 6, kind: input, shape index: {}]   ;;  %s2836_s7 = inlined_call_operand.hbm [shape: f32[32,32], index: 7, kind: input, shape index: {}]   ;;  %s2837_s8 = inlined_call_operand.hbm [shape: f32[1,32], index: 8, kind: input, shape index: {}]   ;;  %s2838_s9 = inlined_call_operand.vmem [shape: f32[32,32], index: 9, kind: input, shape index: {}]   ;;  %s2839_s10 = inlined_call_operand.vmem [shape: f32[1,32], index: 10, kind: input, shape index: {}]   ;;  %s2840_s11 = inlined_call_operand.hbm [shape: f32[4,8,32], index: 11, kind: output, shape index: {}]  }
   0x1   :  { %2846 = sst [smem:[#allocation20_spill]] %s2830_s1 }
   0x2   :  { %2847 = sst [smem:[#allocation21_spill]] %s2838_s9 }
   0x3   :  { %2848 = sst [smem:[#allocation22_spill]] %s2839_s10 }
   0x4   :  { %2849 = sst [smem:[#allocation23_spill]] %s2840_s11 }
   0x5   :  { %16 = vsyncpa [#allocation3], 0 }
   0x6   :  { %18 = vsyncpa [#allocation3 + $0x1], 0 }
   0x7   :  { %19 = vsyncpa [#allocation6], 0 }
   0x8   :  { %20 = vsyncpa [#allocation9], 0 }
   0x9   :  { %21 = vsyncpa [#allocation12], 0 }
   0xa   :  { %22 = vsyncpa [#allocation4], 0 }
   0xb   :  { %24 = vsyncpa [#allocation4 + $0x1], 0  ;;  %s2388_s17 = smov 0   ;;  %s2390_s18 = smov 0  }
   0xc   :  { %s2392_s19 = smov 0   ;;  %s2394_s20 = smov 0  }
   0xd LB: > { %s2307_s21 = smov [#allocation5]   ;;  %s2409_s23 = sadd.s32 4294967295, %s2305_s20   ;;  %s2305_s20 = sphi %s2394_s20, %s2875_s20   ;;  %s2301_s19 = sphi %s2392_s19, %s2874_s19   ;;  %s2297_s18 = sphi %s2390_s18, %s2873_s18   ;;  %s2293_s17 = sphi %s2388_s17, %s2872_s17  }
   0xe   : > { %s309_s22 = sshll.u32 %s2307_s21, 4  ;;  %p1695_p0 = scmp.ge.s32.totalorder %s2305_s20, 1  ;;  %s2414_s22 = int_to_ptr.vmem [resolvable:$true] %s309_s22 }
   0xf   : > { %p2843_p1 = scmp.eq.s32.totalorder %s2409_s23, 0  ;;  %p297_p2 = scmp.lt.s32.totalorder %s2305_s20, 5 }
  0x10   : > { %s2308_s25 = smov [#allocation8]   ;;  %s2309_s28 = smov [#allocation11]  }
  0x11   : > { %p2416_p3 = pnand %p1695_p0, %p297_p2  ;;  %s342_s26 = sshll.u32 %s2308_s25, 4  ;;  %s2428_s26 = int_to_ptr.vmem [resolvable:$true] %s342_s26 }
  0x12   : > { %s363_s29 = sshll.u32 %s2309_s28, 4  ;;  %s2852_s1 = sld [smem:[#allocation20_spill]]  ;;  %s2430_s29 = int_to_ptr.vmem [resolvable:$true] %s363_s29 }
  0x13   : > { %s2850_s24 = scalar_select %p2416_p3, 1, 0 }
  0x14   : > { %p1913_p4 = pneg %p2416_p3 }
  0x16   : > { %p2424_p5 = pnand %p1913_p4, %p2843_p1 }
  0x18   : > { %s2029_s13 = scalar_lea.hbm %s2852_s1, 512  ;;  %p2440_p7 = pneg %p2424_p5 }
  0x19   : > { %p2030_p6 = scmp.ne.s32.totalorder %s2852_s1, %s2029_s13  ;;  %p2036_p10 = scmp.lt.u32.totalorder %s2029_s13, %s2852_s1 }
  0x1b   : > { %p2032_p8 = pnand %p2440_p7, %p2030_p6 }
  0x1d   : > { %p2033_p9 = pneg %p2032_p8 }
  0x1f   : > { %p2038_p11 = pnand %p2036_p10, %p2033_p9 }
  0x21   : > { %2041 = shalt.err (!%p2038_p11)
}
  0x22   : > { %s2042_s28 = scalar_lea.vmem %s2414_s22, 512  ;;  %p2050_p2 = scmp.lt.s32.totalorder %s2414_s22, %s2414_s22 }
  0x23   : > { %p2043_p12 = scmp.ne.s32.totalorder %s2414_s22, %s2042_s28  ;;  %p2051_p4 = scmp.lt.s32.totalorder %s2042_s28, %s2042_s28 }
  0x25   : > { %p2045_p13 = pnand %p2043_p12, %p2440_p7  ;;  %p2052_p6 = por %p2051_p4, %p2050_p2 }
  0x27   : > { %p2046_p0 = pneg %p2045_p13 }
  0x29   : > { %p2053_p8 = pnand %p2052_p6, %p2046_p0 }
  0x2b   : > { %2056 = shalt.err (!%p2053_p8)
}
  0x2c   : > { %s2310_s30 = smov 128   ;;  %s2311_s12 = smov 8  }
  0x2d   : > { %1916 = dma.hbm_to_vmem [thread:$0]  (!%p2424_p5), %s2852_s1, 512, %s2414_s22, [#allocation6], %s2310_s30, %s2310_s30, %s2311_s12  }
  0x2e   : > { %s2057_s25 = scalar_lea.hbm %s2834_s5, 16 }
  0x2f   : > { %p2058_p9 = scmp.ne.s32.totalorder %s2834_s5, %s2057_s25  ;;  %p2064_p12 = scmp.lt.u32.totalorder %s2057_s25, %s2834_s5 }
  0x31   : > { %p2060_p10 = pnand %p2058_p9, %p2440_p7 }
  0x33   : > { %p2061_p11 = pneg %p2060_p10 }
  0x35   : > { %p2066_p13 = pnand %p2064_p12, %p2061_p11 }
  0x37   : > { %2069 = shalt.err (!%p2066_p13)
}
  0x38   : > { %s2070_s22 = scalar_lea.vmem %s2428_s26, 16  ;;  %s2077_s11 = scalar_lea.vmem %s2428_s26, 32 }
  0x39   : > { %p2071_p0 = scmp.ne.s32.totalorder %s2428_s26, %s2070_s22  ;;  %p2078_p6 = scmp.lt.s32.totalorder %s2428_s26, %s2428_s26 }
  0x3a   : > { %p2079_p8 = scmp.lt.s32.totalorder %s2077_s11, %s2070_s22 }
  0x3b   : > { %p2073_p2 = pnand %p2071_p0, %p2440_p7 }
  0x3c   : > { %p2080_p9 = por %p2079_p8, %p2078_p6 }
  0x3d   : > { %p2074_p4 = pneg %p2073_p2 }
  0x3f   : > { %p2081_p10 = pnand %p2080_p9, %p2074_p4 }
  0x41   : > { %2084 = shalt.err (!%p2081_p10)
}
  0x42   : > { %1922 = dma.hbm_to_vmem [thread:$0]  (!%p2424_p5), %s2834_s5, 16, %s2428_s26, [#allocation9]  }
  0x43   : > { %s2085_s15 = scalar_lea.hbm %s2836_s7, 512 }
  0x44   : > { %p2086_p11 = scmp.ne.s32.totalorder %s2836_s7, %s2085_s15  ;;  %p2092_p0 = scmp.lt.u32.totalorder %s2085_s15, %s2836_s7 }
  0x46   : > { %p2088_p12 = pnand %p2086_p11, %p2440_p7 }
  0x48   : > { %p2089_p13 = pneg %p2088_p12 }
  0x4a   : > { %p2094_p2 = pnand %p2092_p0, %p2089_p13 }
  0x4c   : > { %2097 = shalt.err (!%p2094_p2)
}
  0x4d   : > { %s2098_s26 = scalar_lea.vmem %s2430_s29, 512  ;;  %p2106_p9 = scmp.lt.s32.totalorder %s2430_s29, %s2430_s29 }
  0x4e   : > { %p2099_p4 = scmp.ne.s32.totalorder %s2430_s29, %s2098_s26  ;;  %p2107_p10 = scmp.lt.s32.totalorder %s2098_s26, %s2098_s26 }
  0x50   : > { %p2101_p6 = pnand %p2099_p4, %p2440_p7  ;;  %p2108_p11 = por %p2107_p10, %p2106_p9 }
  0x52   : > { %p2102_p8 = pneg %p2101_p6 }
  0x54   : > { %p2109_p12 = pnand %p2108_p11, %p2102_p8 }
  0x56   : > { %2112 = shalt.err (!%p2109_p12)
}
  0x57   : > { %1928 = dma.hbm_to_vmem [thread:$0]  (!%p2424_p5), %s2836_s7, 512, %s2430_s29, [#allocation12], %s2310_s30, %s2310_s30, %s2311_s12  }
  0x58   : > { %s2312_s10 = smov [#allocation7]   ;;  %s2313_s14 = smov [#allocation10]  }
  0x59   : > { %s325_s13 = sshll.u32 %s2312_s10, 4  ;;  %s353_s15 = sshll.u32 %s2313_s14, 4  ;;  %s326_s13 = int_to_ptr.vmem [resolvable:$true] %s325_s13  ;;  %s354_s15 = int_to_ptr.vmem [resolvable:$true] %s353_s15 }
  0x5a   : > { %s2113_s28 = scalar_lea.hbm %s2832_s3, 512 }
  0x5b   : > { %p2114_p13 = scmp.ne.s32.totalorder %s2832_s3, %s2113_s28  ;;  %p2120_p4 = scmp.lt.u32.totalorder %s2113_s28, %s2832_s3 }
  0x5d   : > { %p2116_p0 = pnand %p2114_p13, %p2440_p7 }
  0x5f   : > { %p2117_p2 = pneg %p2116_p0 }
  0x61   : > { %p2122_p6 = pnand %p2120_p4, %p2117_p2 }
  0x63   : > { %2125 = shalt.err (!%p2122_p6)
}
  0x64   : > { %s2126_s29 = scalar_lea.vmem %s326_s13, 512  ;;  %p2134_p11 = scmp.lt.s32.totalorder %s326_s13, %s326_s13 }
  0x65   : > { %p2127_p8 = scmp.ne.s32.totalorder %s326_s13, %s2126_s29  ;;  %p2135_p12 = scmp.lt.s32.totalorder %s2126_s29, %s2126_s29 }
  0x67   : > { %p2129_p9 = pnand %p2127_p8, %p2440_p7  ;;  %p2136_p1 = por %p2135_p12, %p2134_p11 }
  0x69   : > { %p2130_p10 = pneg %p2129_p9 }
  0x6b   : > { %p2137_p3 = pnand %p2136_p1, %p2130_p10 }
  0x6d   : > { %2140 = shalt.err (!%p2137_p3)
}
  0x6e   : > { %1919 = dma.hbm_to_vmem [thread:$0]  (!%p2424_p5), %s2832_s3, 512, %s326_s13, [#allocation6], %s2310_s30, %s2310_s30, %s2311_s12  }
  0x6f   : > { %s2141_s21 = scalar_lea.hbm %s2835_s6, 16 }
  0x70   : > { %p2142_p1 = scmp.ne.s32.totalorder %s2835_s6, %s2141_s21  ;;  %p2148_p0 = scmp.lt.u32.totalorder %s2141_s21, %s2835_s6 }
  0x72   : > { %p2144_p3 = pnand %p2142_p1, %p2440_p7 }
  0x74   : > { %p2145_p13 = pneg %p2144_p3 }
  0x76   : > { %p2150_p2 = pnand %p2148_p0, %p2145_p13 }
  0x78   : > { %2153 = shalt.err (!%p2150_p2)
}
  0x79   : > { %s2154_s11 = scalar_lea.vmem %s354_s15, 16  ;;  %s2161_s30 = scalar_lea.vmem %s354_s15, 32 }
  0x7a   : > { %p2155_p4 = scmp.ne.s32.totalorder %s354_s15, %s2154_s11  ;;  %p2162_p9 = scmp.lt.s32.totalorder %s354_s15, %s354_s15 }
  0x7b   : > { %p2163_p10 = scmp.lt.s32.totalorder %s2161_s30, %s2154_s11 }
  0x7c   : > { %p2157_p6 = pnand %p2155_p4, %p2440_p7 }
  0x7d   : > { %p2164_p11 = por %p2163_p10, %p2162_p9 }
  0x7e   : > { %p2158_p8 = pneg %p2157_p6 }
  0x80   : > { %p2165_p12 = pnand %p2164_p11, %p2158_p8 }
  0x82   : > { %2168 = shalt.err (!%p2165_p12)
}
  0x83   : > { %1925 = dma.hbm_to_vmem [thread:$0]  (!%p2424_p5), %s2835_s6, 16, %s354_s15, [#allocation9]  }
  0x84   : > { %s2314_s29 = smov [#allocation13]   ;;  %s2169_s14 = scalar_lea.hbm %s2837_s8, 16 }
  0x85   : > { %s377_s1 = sshll.u32 %s2314_s29, 4  ;;  %p2170_p1 = scmp.ne.s32.totalorder %s2837_s8, %s2169_s14  ;;  %s378_s1 = int_to_ptr.vmem [resolvable:$true] %s377_s1 }
  0x86   : > { %p2176_p0 = scmp.lt.u32.totalorder %s2169_s14, %s2837_s8 }
  0x87   : > { %p2172_p3 = pnand %p2170_p1, %p2440_p7 }
  0x89   : > { %p2173_p13 = pneg %p2172_p3 }
  0x8b   : > { %p2178_p2 = pnand %p2176_p0, %p2173_p13 }
  0x8d   : > { %2181 = shalt.err (!%p2178_p2)
}
  0x8e   : > { %s2182_s15 = scalar_lea.vmem %s378_s1, 16  ;;  %s2189_s26 = scalar_lea.vmem %s378_s1, 32 }
  0x8f   : > { %p2183_p4 = scmp.ne.s32.totalorder %s378_s1, %s2182_s15  ;;  %p2190_p9 = scmp.lt.s32.totalorder %s378_s1, %s378_s1 }
  0x90   : > { %p2191_p10 = scmp.lt.s32.totalorder %s2189_s26, %s2182_s15 }
  0x91   : > { %p2185_p6 = pnand %p2183_p4, %p2440_p7 }
  0x92   : > { %p2192_p11 = por %p2191_p10, %p2190_p9 }
  0x93   : > { %p2186_p8 = pneg %p2185_p6 }
  0x95   : > { %p2193_p12 = pnand %p2192_p11, %p2186_p8 }
  0x97   : > { %2196 = shalt.err (!%p2193_p12)
}
  0x98   : > { %1931 = dma.hbm_to_vmem [thread:$0]  (!%p2424_p5), %s2837_s8, 16, %s378_s1, [#allocation12]  }
  0x99   : > { %s1694_s16 = sadd.s32 4294967294, %s2305_s20   ;;  %s2573_s27 = sadd.s32 1, %s2305_s20  }
  0x9a   : > { %s34_s12 = ssub.s32 %s2305_s20, %s2573_s27  ;;  %s37_s13 = sadd.s32 1, %s2301_s19 }
  0x9b   : > { %p35_p7 = scmp.eq.s32.totalorder %s34_s12, 0  ;;  %p44_p1 = scmp.ne.s32.totalorder %s2301_s19, %s2297_s18 }
  0x9c   : > { %p45_p3 = scmp.eq.s32.totalorder %s2305_s20, 0  ;;  %p50_p13 = scmp.ne.s32.totalorder %s2297_s18, %s2293_s17 }
  0x9d   : > { %s2584_s29 = scalar_select %p35_p7, %s2301_s19, %s37_s13  }
  0x9e   : > { %p2586_p0 = por %p45_p3, %p44_p1  ;;  %p2855_p2 = scmp.eq.s32.totalorder %s2409_s23, 0 }
  0x9f   : > { %p284_p4 = scmp.eq.s32.totalorder %s2409_s23, 3  ;;  %p290_p6 = scmp.eq.s32.totalorder %s1694_s16, 3 }
  0xa0   : > { %p2592_p5 = por %p2855_p2, %p50_p13  ;;  %p1946_p8 = scmp.lt.s32.totalorder %s2305_s20, 4 }
  0xa1   : > { %s394_s10 = sand.u32 1, %s2301_s19   ;;  %p2599_p9 = por %p284_p4, %p44_p1 }
  0xa2   : > { %p2603_p10 = por %p290_p6, %p50_p13  ;;  %s1703_s25 = sshll.u32 %s394_s10, 3 }
  0xa3   : > { %s2857_s14 = scalar_select %p2599_p9, 1, 0 }
  0xa4   : > { %s2858_s21 = scalar_select %p2603_p10, 1, 0 }
  0xa5   : > { %s1704_s28 = sshll.u32 %s2305_s20, 7  ;;  %s398_s11 = scalar_lea.vmem [#allocation2], %s1703_s25 }
  0xa6   : > { %s2611_s26 = scalar_lea.hbm %s2829_s0, %s1704_s28  ;;  %s405_s30 = sshll.u32 %s398_s11, 4  ;;  %s2613_s30 = int_to_ptr.vmem [resolvable:$true] %s405_s30 }
  0xa7   : > { %p2617_p11 = pnand %p1946_p8, %p2586_p0  ;;  %s395_s12 = scalar_lea.sflag [#allocation3], %s394_s10 }
  0xa8   : > { %s2197_s13 = scalar_lea.hbm %s2611_s26, 128  ;;  %s2202_s22 = scalar_lea.hbm %s2829_s0, 512 }
  0xa9   : > { %p2198_p12 = scmp.ne.s32.totalorder %s2611_s26, %s2197_s13  ;;  %p2199_p7 = pneg %p2617_p11 }
  0xaa   : > { %p2203_p13 = scmp.lt.u32.totalorder %s2611_s26, %s2829_s0  ;;  %p2204_p0 = scmp.lt.u32.totalorder %s2202_s22, %s2197_s13 }
  0xab   : > { %p2200_p1 = pnand %p2199_p7, %p2198_p12  ;;  %p2206_p4 = scmp.lt.u32.totalorder %s2197_s13, %s2611_s26 }
  0xac   : > { %p2205_p2 = por %p2204_p0, %p2203_p13 }
  0xad   : > { %p2201_p3 = pneg %p2200_p1 }
  0xae   : > { %p2207_p6 = por %p2206_p4, %p2205_p2 }
  0xb0   : > { %p2208_p8 = pnand %p2207_p6, %p2201_p3 }
  0xb2   : > { %2211 = shalt.err (!%p2208_p8)
}
  0xb3   : > { %s2212_s10 = scalar_lea.vmem %s2613_s30, 128  ;;  %s2315_s11 = smov [#allocation2]  }
  0xb4   : > { %p2213_p12 = scmp.ne.s32.totalorder %s2613_s30, %s2212_s10  ;;  %s2217_s25 = sshll.u32 %s2315_s11, 4  ;;  %s2218_s25 = int_to_ptr.vmem [resolvable:$false] %s2217_s25 }
  0xb5   : > { %s2219_s28 = scalar_lea.vmem %s2218_s25, 256  ;;  %p2220_p9 = scmp.lt.s32.totalorder %s2613_s30, %s2218_s25 }
  0xb6   : > { %p2215_p1 = pnand %p2213_p12, %p2199_p7  ;;  %p2221_p13 = scmp.lt.s32.totalorder %s2219_s28, %s2212_s10 }
  0xb8   : > { %p2216_p10 = pneg %p2215_p1  ;;  %p2222_p0 = por %p2221_p13, %p2220_p9 }
  0xba   : > { %p2223_p2 = pnand %p2222_p0, %p2216_p10 }
  0xbc   : > { %2226 = shalt.err (!%p2223_p2)
}
  0xbd   : > { %1935 = dma.hbm_to_vmem [thread:$0]  (!%p2617_p11), %s2611_s26, 128, %s2613_s30, %s395_s12  }
  0xbe   : > { %p2860_p3 = scmp.ne.s32.totalorder %s2850_s24, 0 }
  0xbf   : > { %s2649_s13 = sand.u32 (!%p2860_p3), 1, %s2297_s18  }
  0xc0   : > { %414 = sbr.rel (%p2860_p3) target bundleno = 2844 (0xb1c), region = 64  ;;  %s1706_s22 = sshll.u32 (!%p2860_p3), %s2649_s13, 3 }
  0xc1   : > { %s417_s9 = scalar_lea.sflag (!%p2860_p3), [#allocation3], %s2649_s13  ;;  %s420_s15 = scalar_lea.vmem (!%p2860_p3), [#allocation2], %s1706_s22 }
  0xc7   : > { %2272 = dma.done.wait (%p2592_p5), %s417_s9, 128  }
  0xc8   : > { %2274 = vsyncadd (%p2592_p5), %s417_s9, 4294967168  ;;  %p2861_p9 = scmp.eq.s32.totalorder %s2409_s23, 0 }
  0xca   : > { %2276 = dma.done.wait (%p2861_p9), [#allocation6], 1024   ;;  %p2862_p10 = pmov %p2861_p9 }
  0xcb   : > { %p2863_p11 = pmov %p2861_p9 }
  0xcc   : > { %2278 = vsyncadd (%p2862_p10), [#allocation6], 4294966272 }
  0xcd   : > { %2280 = dma.done.wait (%p2863_p11), [#allocation9], 32   ;;  %p2864_p7 = pmov %p2861_p9 }
  0xcf   : > { %2282 = vsyncadd (%p2864_p7), [#allocation9], 4294967264  ;;  %p2865_p4 = pmov %p2864_p7 }
  0xd1   : > { %2284 = dma.done.wait (%p2865_p4), [#allocation12], 528   ;;  %p2866_p6 = pmov %p2865_p4 }
  0xd2   : > { %v2316_v0 = vmov 0.0|0.0   ;;  %vm2317_vm0 = vmmov 0   ;;  %v2318_v1 = vmov 0.0   ;;  %v484_v2 = vld [vmem:[#allocation5] sm:$0xff]  ;;  %v485_v3 = vld [vmem:[#allocation5 + $0x8] sm:$0xff]  ;;  %v486_v4 = vld [vmem:[#allocation5 + $0x10] sm:$0xff] }
  0xd3   : > { %2286 = vsyncadd (%p2866_p6), [#allocation12], 4294966768  ;;  %1861 = vmatprep.subr.bf16.mxu0 %v2316_v0  ;;  %1785 = vmatprep.mubr.msk.f32.mxu0 %vm2317_vm0, %v2318_v1  ;;  %v1862_v5 = vpack.c.bf16 %v485_v3, %v484_v2  ;;  %v487_v6 = vld [vmem:[#allocation5 + $0x18] sm:$0xff]  ;;  %vm495_vm1 = vcmask 261120   ;;  %v1714_v9 = vld [vmem:[%s2831_s2] ss:$0 sm:$0xff] }
  0xd4   : > { %1788 = vmatprep.subr.mxu1 %v2318_v1  ;;  %1790 = vmatprep.mubr.msk.f32.mxu1 %vm2317_vm0, %v2318_v1  ;;  %v1865_v7 = vpack.c.bf16 %v487_v6, %v486_v4  ;;  %v2678_v8 = vld [vmem:[%s420_s15] sm:$0xff]  ;;  %s2319_s26 = smov 104   ;;  %s2320_s30 = smov 120   ;;  %vm578_vm2 = vcmask 64512   ;;  %vm1242_vm3 = vcmask 130048   ;;  %vm1244_vm4 = vcmask 195584  }
  0xd5   : > { %1863 = vmatpush3.bf16.msra.mxu0 %v1862_v5  ;;  %s2321_s16 = smov 96   ;;  %s2322_s12 = smov 112  }
  0xd6   : > { %1864 = vmatprep.subr.bf16.mxu0 %v2316_v0  ;;  %s2323_s10 = smov 64   ;;  %s2324_s11 = smov 8  }
  0xd7   : > { %s2325_s25 = smov 16   ;;  %s2326_s28 = smov 24  }
  0xd8   : > { %s2868_s15 = sld [smem:[#allocation22_spill]]  ;;  %s1738_s24 = sshll.u32 %s2409_s23, 7 }
  0xd9   : > { %1866 = vmatpush3.bf16.msra.mxu0 %v1865_v7  ;;  %s482_s1 = scalar_lea.vmem [#allocation14], %s1706_s22  ;;  %p2870_p8 = scmp.ne.s32.totalorder %s2857_s14, 0 }
  0xda   : > { %1808 = vmatprep.subr.mxu0 %v2318_v1  ;;  %s2327_s23 = smov [#allocation14]  }
  0xdb   : > { %s2231_s22 = sshll.u32 %s2327_s23, 4  ;;  %s2232_s22 = int_to_ptr.vmem [resolvable:$false] %s2231_s22 }
  0xdc   : > { %1786 = vmatmul.mubr.msk.f32.vlgmr.msra.gmra.mrb[0].mxu0 %vm495_vm1, %v2678_v8  ;;  %s2233_s9 = scalar_lea.vmem %s2232_s22, 256 }
  0xdd   : > { %1810 = vmatprep.mubr.msk.f32.mxu0 %vm2317_vm0, %v2318_v1 }
 0x1af   : > { %v565_v10 = vpop.f32.mrb[0].mxu0 }
 0x1b0   : > { %v566_v11 = vadd.f32 %v1714_v9, %v565_v10  ;;  %v1787_v12 = vpop.f32.mrb[1].mxu0  ;;  %v1246_v9 = vld [vmem:[#allocation7] sm:$0xff]  ;;  %v1247_v10 = vld [vmem:[#allocation7 + $0x8] sm:$0xff] }
 0x1b1   : > { %v1248_v12 = vld [vmem:[#allocation7 + $0x10] sm:$0xff] }
 0x1b2   : > { %574 = vrot.lane.b32.xlu1 %v566_v11, %s2319_s26  ;;  %570 = vrot.lane.b32.xlu0 %v566_v11, %s2320_s30  ;;  %s2867_s26 = sld [smem:[#allocation21_spill]]  ;;  %s1567_s30 = sshll.u32 %s482_s1, 4  ;;  %s2787_s30 = int_to_ptr.vmem [resolvable:$true] %s1567_s30 }
 0x1b3   : > { %p2234_p13 = scmp.lt.s32.totalorder %s2787_s30, %s2232_s22 }
 0x1b6   : > { %576 = vrot.lane.b32.xlu1 %v566_v11, %s2321_s16  ;;  %572 = vrot.lane.b32.xlu0 %v566_v11, %s2322_s12 }
 0x224   : > { %v2688_v13 = vpop.permute.xlu1 %574  ;;  %v571_v14 = vpop.permute.xlu0 %570 }
 0x225   : > { %653 = vrot.lane.b32.xlu0 %v571_v14, %s2321_s16 }
 0x228   : > { %v577_v15 = vpop.permute.xlu1 %576  ;;  %v2690_v16 = vpop.permute.xlu0 %572 }
 0x229   : > { %1789 = vmatpush3.xpose.msk.msra.mxu1 %vm578_vm2, %v577_v15  ;;  %805 = vrot.lane.b32.xlu0 %v2688_v13, %s2321_s16 }
 0x22a   : > { %729 = vrot.lane.b32.xlu1 %v2690_v16, %s2321_s16  ;;  %1793 = vmatprep.subr.mxu1 %v2318_v1 }
 0x22c   : > { %1791 = vmatmul.mubr.msk.f32.vlgmr.msra.gmra.mrb[0].mxu1 %vm578_vm2, %v566_v11 }
 0x22d   : > { %1795 = vmatprep.mubr.msk.f32.mxu1 %vm2317_vm0, %v2318_v1 }
 0x297   : > { %v654_v17 = vpop.permute.xlu0 %653 }
 0x298   : > { %1794 = vmatpush3.xpose.msk.msra.mxu1 %vm578_vm2, %v654_v17 }
 0x299   : > { %1798 = vmatprep.subr.mxu1 %v2318_v1 }
 0x29b   : > { %1796 = vmatmul.mubr.msk.f32.vlgmr.msra.gmra.mrb[2].mxu1 %vm578_vm2, %v571_v14  ;;  %v806_v19 = vpop.permute.xlu0 %805 }
 0x29c   : > { %v730_v18 = vpop.permute.xlu1 %729  ;;  %1800 = vmatprep.mubr.msk.f32.mxu1 %vm2317_vm0, %v2318_v1 }
 0x29d   : > { %1799 = vmatpush3.xpose.msk.msra.mxu1 %vm578_vm2, %v730_v18 }
 0x29e   : > { %1803 = vmatprep.subr.mxu1 %v2318_v1 }
 0x2a0   : > { %1801 = vmatmul.mubr.msk.f32.vlgmr.msra.gmra.mrb[4].mxu1 %vm578_vm2, %v2690_v16 }
 0x2a1   : > { %1804 = vmatpush3.xpose.msk.msra.mxu1 %vm578_vm2, %v806_v19  ;;  %1805 = vmatprep.mubr.msk.f32.mxu1 %vm2317_vm0, %v2318_v1 }
 0x2a2   : > { %1813 = vmatprep.subr.mxu1 %v2318_v1 }
 0x2a4   : > { %1806 = vmatmul.mubr.msk.f32.vlgmr.msra.gmra.mrb[6].mxu1 %vm578_vm2, %v2688_v13 }
 0x2a5   : > { %1815 = vmatprep.mubr.msk.f32.mxu1 %vm2317_vm0, %v2318_v1 }
 0x2ff   : > { %v649_v20 = vpop.f32.mrb[0].mxu1 }
 0x300   : > { %v1792_v21 = vpop.f32.mrb[1].mxu1  ;;  %v881_v22 = vsel %vm578_vm2, %v649_v20, -inf }
 0x301   : > { %882 = vmax.xlane.f32.xlu1 %v881_v22 }
 0x36e   : > { %v725_v23 = vpop.f32.mrb[2].mxu1 }
 0x36f   : > { %v1797_v24 = vpop.f32.mrb[3].mxu1  ;;  %v884_v25 = vsel %vm578_vm2, %v725_v23, -inf }
 0x370   : > { %885 = vmax.xlane.f32.xlu0 %v884_v25 }
 0x373   : > { %v801_v26 = vpop.f32.mrb[4].mxu1 }
 0x374   : > { %v1802_v27 = vpop.f32.mrb[5].mxu1  ;;  %v887_v28 = vsel %vm578_vm2, %v801_v26, -inf }
 0x375   : > { %888 = vmax.xlane.f32.xlu0 %v887_v28  ;;  %v1728_v27 = vld [vmem:[%s2833_s4] ss:$0 sm:$0xff] }
 0x377   : > { %v877_v29 = vpop.f32.mrb[6].mxu1 }
 0x378   : > { %v1807_v30 = vpop.f32.mrb[7].mxu1  ;;  %v890_v31 = vsel %vm578_vm2, %v877_v29, -inf }
 0x379   : > { %891 = vmax.xlane.f32.xlu1 %v890_v31 }
 0x38a   : > { %1001 = vrot.lane.b32.xlu1 %v571_v14, %s2323_s10 }
 0x38b   : > { %925 = vrot.lane.b32.xlu0 %v566_v11, %s2323_s10  ;;  %v1868_v11 = vpack.c.bf16 %v1247_v10, %v1246_v9 }
 0x38e   : > { %v883_v32 = vpop.xlane.xlu1 %882 }
 0x38f   : > { %v893_v33 = vsub.f32 %v649_v20, %v883_v32 }
 0x391   : > { %v897_v34 = vmul.f32 1.442695, %v893_v33 }
 0x393   : > { %2005 = vpow2.f32 %v897_v34 }
 0x39d   : > { %v2006_v35 = vpop.eup %2005 }
 0x39e   : > { %v905_v36 = vsel %vm578_vm2, %v2006_v35, 0.0 }
 0x3aa   : > { %906 = vadd.xlane.f32.xlu0 %v905_v36 }
 0x3fd   : > { %v886_v37 = vpop.xlane.xlu0 %885 }
 0x3fe   : > { %v894_v38 = vsub.f32 %v725_v23, %v886_v37 }
 0x400   : > { %v899_v39 = vmul.f32 1.442695, %v894_v38  ;;  %v1362_v38 = vld [vmem:[#allocation11 + $0x8] sm:$0xff] }
 0x402   : > { %2007 = vpow2.f32 %v899_v39  ;;  %v889_v40 = vpop.xlane.xlu0 %888 }
 0x403   : > { %v895_v41 = vsub.f32 %v801_v26, %v889_v40  ;;  %v1363_v40 = vld [vmem:[#allocation11 + $0x10] sm:$0xff] }
 0x405   : > { %v901_v42 = vmul.f32 1.442695, %v895_v41  ;;  %v1364_v41 = vld [vmem:[#allocation11 + $0x18] sm:$0xff] }
 0x406   : > { %v892_v43 = vpop.xlane.xlu1 %891  ;;  %v926_v44 = vpop.permute.xlu0 %925 }
 0x407   : > { %2009 = vpow2.f32 %v901_v42  ;;  %v896_v45 = vsub.f32 %v877_v29, %v892_v43  ;;  %1809 = vmatpush3.msra.mxu0 %v926_v44  ;;  %v1877_v42 = vpack.c.bf16 %v1364_v41, %v1363_v40 }
 0x408   : > { %1818 = vmatprep.subr.mxu0 %v2318_v1 }
 0x409   : > { %v903_v46 = vmul.f32 1.442695, %v896_v45 }
 0x40a   : > { %v1002_v47 = vpop.permute.xlu1 %1001 }
 0x40b   : > { %2011 = vpow2.f32 %v903_v46  ;;  %1814 = vmatpush3.msra.mxu1 %v1002_v47  ;;  %v1730_v46 = vld [vmem:[#allocation8] ss:$0 sm:$0xff] }
 0x40c   : > { %v2008_v48 = vpop.eup %2007  ;;  %1823 = vmatprep.subr.mxu1 %v2318_v1 }
 0x40d   : > { %v908_v49 = vsel %vm578_vm2, %v2008_v48, 0.0 }
 0x40e   : > { %909 = vadd.xlane.f32.xlu1 %v908_v49 }
 0x411   : > { %v2010_v50 = vpop.eup %2009 }
 0x412   : > { %v911_v51 = vsel %vm578_vm2, %v2010_v50, 0.0 }
 0x413   : > { %912 = vadd.xlane.f32.xlu0 %v911_v51  ;;  %v1452_v51 = vld [vmem:[%s2867_s26] sm:$0xff] }
 0x415   : > { %v2012_v52 = vpop.eup %2011 }
 0x416   : > { %v914_v53 = vsel %vm578_vm2, %v2012_v52, 0.0 }
 0x417   : > { %915 = vadd.xlane.f32.xlu1 %v914_v53 }
 0x428   : > { %1077 = vrot.lane.b32.xlu1 %v2690_v16, %s2323_s10 }
 0x429   : > { %1153 = vrot.lane.b32.xlu0 %v2688_v13, %s2323_s10  ;;  %v1249_v13 = vld [vmem:[#allocation7 + $0x18] sm:$0xff]  ;;  %s2869_s10 = sld [smem:[#allocation23_spill]] }
 0x42a   : > { %v1871_v14 = vpack.c.bf16 %v1249_v13, %v1248_v12 }
 0x437   : > { %v907_v54 = vpop.xlane.xlu0 %906 }
 0x438   : > { %2013 = vrcp.f32 %v907_v54  ;;  %v1454_v54 = vld [vmem:[%s2867_s26 + $0x10] sm:$0xff] }
 0x442   : > { %v2014_v55 = vpop.eup %2013 }
 0x443   : > { %v918_v56 = vmul.f32 %v2014_v55, %v2006_v35  ;;  %v1455_v55 = vld [vmem:[%s2867_s26 + $0x18] sm:$0xff] }
 0x445   : > { %1811 = vmatmul.mubr.msk.f32.vlgmr.msra.gmra.mrb[2].mxu0 %vm578_vm2, %v918_v56  ;;  %v1883_v56 = vpack.c.bf16 %v1455_v55, %v1454_v54 }
 0x446   : > { %1820 = vmatprep.mubr.msk.f32.mxu0 %vm2317_vm0, %v2318_v1 }
 0x49b   : > { %v910_v57 = vpop.xlane.xlu1 %909 }
 0x49c   : > { %2015 = vrcp.f32 %v910_v57  ;;  %v1732_v57 = vld [vmem:[#allocation13] ss:$0 sm:$0xff] }
 0x4a0   : > { %v913_v58 = vpop.xlane.xlu0 %912 }
 0x4a1   : > { %2017 = vrcp.f32 %v913_v58 }
 0x4a4   : > { %v916_v59 = vpop.xlane.xlu1 %915  ;;  %v1154_v63 = vpop.permute.xlu0 %1153 }
 0x4a5   : > { %2019 = vrcp.f32 %v916_v59 }
 0x4a6   : > { %v2016_v60 = vpop.eup %2015 }
 0x4a7   : > { %v920_v61 = vmul.f32 %v2016_v60, %v2008_v48  ;;  %v1731_v48 = vld [vmem:[#allocation10] ss:$0 sm:$0xff] }
 0x4a8   : > { %v1078_v62 = vpop.permute.xlu1 %1077 }
 0x4a9   : > { %1819 = vmatpush3.msra.mxu0 %v1078_v62  ;;  %1816 = vmatmul.mubr.msk.f32.vlgmr.msra.gmra.mrb[8].mxu1 %vm578_vm2, %v920_v61 }
 0x4aa   : > { %1824 = vmatpush3.msra.mxu1 %v1154_v63  ;;  %1825 = vmatprep.mubr.msk.f32.mxu1 %vm2317_vm0, %v2318_v1 }
 0x4ab   : > { %v2018_v2 = vpop.eup %2017  ;;  %1867 = vmatprep.subr.bf16.mxu0 %v2316_v0  ;;  %1873 = vmatprep.subr.bf16.mxu1 %v2316_v0 }
 0x4ac   : > { %v922_v3 = vmul.f32 %v2018_v2, %v2010_v50 }
 0x4ae   : > { %1821 = vmatmul.mubr.msk.f32.vlgmr.msra.gmra.mrb[4].mxu0 %vm578_vm2, %v922_v3  ;;  %v1735_v3 = vld [vmem:[%s2868_s15] ss:$0 sm:$0xff] }
 0x4af   : > { %v2020_v4 = vpop.eup %2019  ;;  %1836 = vmatprep.mubr.msk.f32.mxu0 %vm2317_vm0, %v2318_v1  ;;  %1869 = vmatpush3.bf16.msra.mxu0 %v1868_v11 }
 0x4b0   : > { %v924_v5 = vmul.f32 %v2020_v4, %v2012_v52  ;;  %1870 = vmatprep.subr.bf16.mxu0 %v2316_v0  ;;  %v1453_v52 = vld [vmem:[%s2867_s26 + $0x8] sm:$0xff] }
 0x4b1   : > { %v1880_v53 = vpack.c.bf16 %v1453_v52, %v1452_v51 }
 0x4b2   : > { %1826 = vmatmul.mubr.msk.f32.vlgmr.msra.gmra.mrb[10].mxu1 %vm578_vm2, %v924_v5 }
 0x4b3   : > { %1847 = vmatprep.mubr.msk.f32.mxu1 %vm2317_vm0, %v2318_v1  ;;  %1872 = vmatpush3.bf16.msra.mxu0 %v1871_v14 }
 0x4b4   : > { %1879 = vmatprep.subr.bf16.mxu0 %v2316_v0 }
 0x518   : > { %v997_v6 = vpop.f32.mrb[2].mxu0 }
 0x519   : > { %v1812_v7 = vpop.f32.mrb[3].mxu0 }
 0x57c   : > { %v1073_v15 = vpop.f32.mrb[8].mxu1 }
 0x57d   : > { %1230 = vrot.lane.b32.xlu1 %v1073_v15, %s2324_s11  ;;  %v1817_v16 = vpop.f32.mrb[9].mxu1  ;;  %s2785_s11 = scalar_lea.hbm %s2869_s10, %s1738_s24 }
 0x581   : > { %v1149_v17 = vpop.f32.mrb[4].mxu0 }
 0x582   : > { %1234 = vrot.lane.b32.xlu0 %v1149_v17, %s2325_s25  ;;  %v1822_v18 = vpop.f32.mrb[5].mxu0  ;;  %s1554_s25 = scalar_lea.sflag [#allocation4], %s2649_s13 }
 0x585   : > { %v1225_v19 = vpop.f32.mrb[10].mxu1 }
 0x586   : > { %1238 = vrot.lane.b32.xlu1 %v1225_v19, %s2326_s28  ;;  %v1827_v20 = vpop.f32.mrb[11].mxu1  ;;  %s2227_s28 = scalar_lea.vmem %s2787_s30, 128 }
 0x587   : > { %p2228_p5 = scmp.ne.s32.totalorder %s2787_s30, %s2227_s28  ;;  %p2235_p0 = scmp.lt.s32.totalorder %s2233_s9, %s2227_s28 }
 0x589   : > { %p2229_p12 = pnand %p2228_p5, %p2870_p8  ;;  %p2236_p2 = por %p2235_p0, %p2234_p13 }
 0x58b   : > { %p2230_p1 = pneg %p2229_p12 }
 0x58d   : > { %p2237_p3 = pnand %p2236_p2, %p2230_p1 }
 0x5ef   : > { %v1231_v21 = vpop.permute.xlu1 %1230 }
 0x5f0   : > { %v1241_v23 = vsel %vm578_vm2, %v997_v6, %v1231_v21 }
 0x5f4   : > { %v1235_v22 = vpop.permute.xlu0 %1234 }
 0x5f5   : > { %v1243_v24 = vsel %vm1242_vm3, %v1241_v23, %v1235_v22 }
 0x5f8   : > { %v1239_v25 = vpop.permute.xlu1 %1238 }
 0x5f9   : > { %v1245_v26 = vsel %vm1244_vm4, %v1243_v24, %v1239_v25 }
 0x5fa   : > { %1837 = vmatmul.mubr.msk.f32.vlgmr.msra.gmra.mrb[6].mxu0 %vm495_vm1, %v1245_v26 }
 0x5fb   : > { %1858 = vmatprep.mubr.msk.f32.mxu0 %vm2317_vm0, %v2318_v1  ;;  %v1361_v1 = vld [vmem:[#allocation11] sm:$0xff]  ;;  %1881 = vmatpush3.bf16.msra.mxu0 %v1880_v53 }
 0x5fc   : > { %v1874_v39 = vpack.c.bf16 %v1362_v38, %v1361_v1  ;;  %1882 = vmatprep.subr.bf16.mxu0 %v2316_v0 }
 0x5fe   : > { %1875 = vmatpush3.bf16.msra.mxu1 %v1874_v39 }
 0x5ff   : > { %1876 = vmatprep.subr.bf16.mxu1 %v2316_v0  ;;  %1884 = vmatpush3.bf16.msra.mxu0 %v1883_v56 }
 0x602   : > { %1878 = vmatpush3.bf16.msra.mxu1 %v1877_v42 }
 0x6cd   : > { %v1326_v28 = vpop.f32.mrb[6].mxu0 }
 0x6ce   : > { %v1327_v29 = vadd.f32 %v1728_v27, %v1326_v28  ;;  %v1838_v30 = vpop.f32.mrb[7].mxu0 }
 0x6d0   : > { %v1332_v31 = vadd.f32 %v1327_v29, %v2678_v8 }
 0x6d2   : > { %v1333_v32 = vsel %vm495_vm1, %v1332_v31, 0.0 }
 0x6d3   : > { %1334 = vadd.xlane.f32.xlu0 %v1333_v32 }
 0x760   : > { %v1335_v33 = vpop.xlane.xlu0 %1334 }
 0x761   : > { %v1337_v34 = vmul.f32 0.03125, %v1335_v33 }
 0x763   : > { %v1338_v35 = vsub.f32 %v1332_v31, %v1337_v34 }
 0x765   : > { %v1339_v36 = vmul.f32 %v1338_v35, %v1338_v35 }
 0x767   : > { %v1340_v37 = vsel %vm495_vm1, %v1339_v36, 0.0 }
 0x768   : > { %1341 = vadd.xlane.f32.xlu1 %v1340_v37 }
 0x7f5   : > { %v1342_v8 = vpop.xlane.xlu1 %1341 }
 0x7f6   : > { %v1343_v43 = vmul.f32 0.03125, %v1342_v8 }
 0x7f8   : > { %v1344_v44 = vadd.f32 1e-05, %v1343_v43 }
 0x7fa   : > { %2021 = vrsqrt.f32 %v1344_v44 }
 0x804   : > { %v2022_v45 = vpop.eup %2021 }
 0x805   : > { %v1346_v47 = vmul.f32 %v2022_v45, %v1338_v35 }
 0x807   : > { %v1353_v49 = vmul.f32 %v1730_v46, %v1346_v47 }
 0x809   : > { %v1360_v50 = vadd.f32 %v1731_v48, %v1353_v49 }
 0x80b   : > { %1848 = vmatmul.mubr.msk.f32.vlgmr.msra.gmra.mrb[12].mxu1 %vm495_vm1, %v1360_v50 }
 0x8de   : > { %v1441_v58 = vpop.f32.mrb[12].mxu1 }
 0x8df   : > { %v1442_v59 = vadd.f32 %v1732_v57, %v1441_v58  ;;  %v1849_v60 = vpop.f32.mrb[13].mxu1 }
 0x8e1   : > { %v1734_v61 = vmul.f32 -1.442695, %v1442_v59 }
 0x8e3   : > { %2023 = vpow2.f32 %v1734_v61 }
 0x8ed   : > { %v2024_v62 = vpop.eup %2023 }
 0x8ee   : > { %v1448_v63 = vadd.f32 1.0, %v2024_v62 }
 0x8f0   : > { %2025 = vrcp.f32 %v1448_v63 }
 0x8fa   : > { %v2026_v0 = vpop.eup %2025 }
 0x8fb   : > { %v1451_v2 = vmul.f32 %v2026_v0, %v1442_v59 }
 0x8fd   : > { %1859 = vmatmul.mubr.msk.f32.vlgmr.msra.gmra.mrb[8].mxu0 %vm495_vm1, %v1451_v2 }
 0x9d0   : > { %v1532_v4 = vpop.f32.mrb[8].mxu0 }
 0x9d1   : > { %v1533_v5 = vadd.f32 %v1735_v3, %v1532_v4  ;;  %v1860_v6 = vpop.f32.mrb[9].mxu0 }
 0x9d3   : > { %v1536_v7 = vadd.f32 %v1533_v5, %v1360_v50 }
 0x9d5   : > { %v1537_v9 = vsel %vm495_vm1, %v1536_v7, 0.0 }
 0x9d6   : > { %1538 = vadd.xlane.f32.xlu0 %v1537_v9 }
 0xa63   : > { %v1539_v10 = vpop.xlane.xlu0 %1538 }
 0xa64   : > { %v1540_v11 = vmul.f32 0.03125, %v1539_v10 }
 0xa66   : > { %v1541_v12 = vsub.f32 %v1536_v7, %v1540_v11 }
 0xa68   : > { %v1542_v13 = vmul.f32 %v1541_v12, %v1541_v12 }
 0xa6a   : > { %v1543_v14 = vsel %vm495_vm1, %v1542_v13, 0.0 }
 0xa6b   : > { %1544 = vadd.xlane.f32.xlu0 %v1543_v14 }
 0xaf8   : > { %v1545_v15 = vpop.xlane.xlu0 %1544 }
 0xaf9   : > { %v1546_v16 = vmul.f32 0.03125, %v1545_v15 }
 0xafb   : > { %v1547_v17 = vadd.f32 1e-05, %v1546_v16 }
 0xafd   : > { %2027 = vrsqrt.f32 %v1547_v17 }
 0xb07   : > { %v2028_v18 = vpop.eup %2027 }
 0xb08   : > { %v1549_v19 = vmul.f32 %v2028_v18, %v1541_v12 }
 0xb0a   : > { %v1550_v20 = vmul.f32 %v1730_v46, %v1549_v19 }
 0xb0c   : > { %v1551_v21 = vadd.f32 %v1731_v48, %v1550_v20 }
 0xb0e   : > { %1552 = vst.msk [vmem:[%s482_s1] sm:$0xff] %vm495_vm1, %v1551_v21 }
 0xb0f   : > { %2240 = shalt.err (!%p2237_p3)
}
 0xb10   : > { %s2241_s13 = scalar_lea.hbm %s2785_s11, 128  ;;  %s2245_s1 = scalar_lea.hbm %s2869_s10, 512 }
 0xb11   : > { %p2242_p9 = scmp.ne.s32.totalorder %s2785_s11, %s2241_s13  ;;  %p2246_p7 = scmp.lt.u32.totalorder %s2785_s11, %s2869_s10 }
 0xb12   : > { %p2247_p4 = scmp.lt.u32.totalorder %s2245_s1, %s2241_s13  ;;  %p2249_p5 = scmp.lt.u32.totalorder %s2241_s13, %s2785_s11 }
 0xb13   : > { %p2243_p10 = pnand %p2242_p9, %p2870_p8 }
 0xb14   : > { %p2248_p6 = por %p2247_p4, %p2246_p7 }
 0xb15   : > { %p2244_p11 = pneg %p2243_p10 }
 0xb16   : > { %p2250_p12 = por %p2249_p5, %p2248_p6 }
 0xb18   : > { %p2251_p1 = pnand %p2250_p12, %p2244_p11 }
 0xb1a   : > { %2254 = shalt.err (!%p2251_p1)
}
 0xb1b   : > { %1911 = dma.vmem_to_hbm [thread:$0]  (%p2870_p8), %s2787_s30, 128, %s2785_s11, %s1554_s25  }
 0xb1c PF: > { %p1953_p13 = scmp.ge.s32.totalorder %s2305_s20, 2  ;;  %s1579_s28 = sand.u32 1, %s2293_s17  }
 0xb1d   : > { %p2871_p0 = scmp.ne.s32.totalorder %s2858_s21, 0  ;;  %s1580_s23 = scalar_lea.sflag [#allocation4], %s1579_s28 }
 0xb1f   : > { %p1937_p2 = pnand %p1953_p13, %p2871_p0 }
 0xb21   : > { %2288 = dma.done.wait (!%p1937_p2), %s1580_s23, 128  }
 0xb22   : > { %2290 = vsyncadd (!%p1937_p2), %s1580_s23, 4294967168  ;;  %p27_p3 = scmp.ge.s32.totalorder %s2573_s27, 6   ;;  %s2872_s17 = smov %s2297_s18 }
 0xb23   : > { %s2873_s18 = smov %s2301_s19  ;;  %s2874_s19 = smov %s2584_s29 }
 0xb24   : > { %s2875_s20 = smov %s2573_s27  ;;  %29 = sbr.rel (!%p27_p3) target bundleno = 13 (0xd), region = 133 }
 0xb2b   :  { %1585 = vsyncpa [#allocation3], 1 }
 0xb2c   :  { %1587 = vsyncpa [#allocation3 + $0x1], 1 }
 0xb2d   :  { %1588 = vsyncpa [#allocation6], 1 }
 0xb2e   :  { %1589 = vsyncpa [#allocation9], 1 }
 0xb2f   :  { %1590 = vsyncpa [#allocation12], 1 }
 0xb30   :  { %1591 = vsyncpa [#allocation4], 1 }
 0xb31   :  { %1593 = vsyncpa [#allocation4 + $0x1], 1 }

</bundles_post_ra>
